<compile_context>
chip_gen: v7x
topology: tpu7x:2x2x1
jax: 0.10.0
libtpu: 0.0.40
codegen_flags: <defaults>
</compile_context>

<pallas_src>
import functools

import jax
import jax.numpy as jnp
from jax.experimental import pallas as pl
from jax.experimental.pallas import tpu as pltpu


def gat_kernel(h_ref, adj_ref, wext_ref, bext_ref, wa1_ref, out_ref,
               *, alpha, n, tb, fout, concat):
    # h_ref:    (TB*N, Fin)  VMEM  node features, graphs flattened along rows
    # adj_ref:  (TB, N, N)   VMEM  adjacency (int8; cast to f32 once)
    # wext_ref: (Fin, Fp)    VMEM  [:, :Fout] = W, [:, Fout] = W @ a_i, rest 0
    # bext_ref: (1, Fp)      VMEM  [:, :Fout] = b_W, [0, Fout] = bW.ai+b_ai + bW.aj+b_aj
    # wa1_ref:  (1, Fin)     VMEM  W @ a_j
    # out_ref:  (TB*N, Fp)   VMEM  lane-dense (padded) output
    h = h_ref[...]                                          # (TB*N, Fin)

    # One projection matmul yields Wh AND the wh1 scores (folded column fout).
    whx = jnp.dot(h, wext_ref[...],
                  preferred_element_type=jnp.float32) + bext_ref[...]   # (TB*N, Fp)

    # wh2 scores for every node of every graph in this step as one row vector.
    wh2_all = jax.lax.dot_general(wa1_ref[...], h, (((1,), (1,)), ((), ())),
                                  preferred_element_type=jnp.float32)   # (1, TB*N)

    adj_f = adj_ref[...].astype(jnp.float32)                # cast once per step

    # Per-graph attention (static unroll; tb is small).
    for g in range(tb):
        r0 = g * n
        wh_g = whx[r0:r0 + n, :]                            # (N, Fp)
        wh1 = wh_g[:, fout:fout + 1]                        # (N, 1) column (all biases)
        wh2 = wh2_all[:, r0:r0 + n]                         # (1, N) row

        e = wh1 + wh2                                       # (N, N)
        e = jnp.where(e > 0, e, alpha * e)                  # LeakyReLU(alpha)

        att = adj_f[g] * e                                  # masked / weighted scores
        m = jnp.max(att, axis=-1, keepdims=True)
        p = jnp.exp(att - m)                                # unnormalized softmax
        l = jnp.sum(p, axis=-1, keepdims=True)
        # TODO(synk): F.dropout on attention weights skipped (eval-mode forward).

        acc = jnp.dot(p, wh_g, preferred_element_type=jnp.float32)      # (N, Fp)
        acc = acc * pl.reciprocal(l, approx=False)          # deferred normalization
        if concat:
            # ELU; exp(x)-1 (negative branch only) keeps the lowering simple.
            acc = jnp.where(acc > 0, acc, jnp.exp(acc) - 1.0)
        # Padded columns (>= Fout) are stripped by the wrapper.
        out_ref[r0:r0 + n, :] = acc


def graph_attention_layer(h, adj, W, bw, a, ab, *, alpha, concat=True, tb=None):
    """W is Wlinear.weight transposed: (Fin, Fout). bw: (1, Fout).
    a: (2, Fout) rows = aiLinear.weight, ajLinear.weight. ab: (2,) their biases."""
    B, N, Fin = h.shape
    Fout = W.shape[1]
    Fp = ((Fout + 1 + 127) // 128) * 128                    # lane-dense + folded wh1 column

    # --- fold the wh1/wh2 matvecs into the projection parameters ---
    wa0 = W @ a[0]                                          # (Fin,)
    wa1 = W @ a[1]                                          # (Fin,)
    bw_flat = bw.reshape(-1)
    c0 = jnp.dot(bw_flat, a[0]) + ab[0]
    c1 = jnp.dot(bw_flat, a[1]) + ab[1]
    W_ext = (jnp.zeros((Fin, Fp), jnp.float32)
             .at[:, :Fout].set(W)
             .at[:, Fout].set(wa0))
    b_ext = (jnp.zeros((1, Fp), jnp.float32)
             .at[:, :Fout].set(bw_flat)
             .at[0, Fout].set(c0 + c1))                     # both constant offsets here
    wa1_row = wa1.reshape(1, Fin)

    # --- graphs per step: sublane-aligned blocks, VMEM budget, grid >= 2 ---
    if tb is None:
        tb = B                                              # grid=1 fallback: always legal
        budget = 8 * 1024 * 1024                            # per-step budget (headroom)
        for cand in range(B - 1, 0, -1):
            if B % cand != 0:
                continue
            if (cand * N) % 8 != 0:                         # keep h/out blocks 8-aligned
                continue
            blk = cand * (N * Fin * 4 + N * N * adj.dtype.itemsize + N * Fp * 4)
            if 2 * blk <= budget:                           # pipeline double-buffers
                tb = cand
                break
    grid = B // tb

    h_flat = h.reshape(B * N, Fin)
    kernel = functools.partial(gat_kernel, alpha=alpha, n=N, tb=tb, fout=Fout,
                               concat=concat)

    out = pl.pallas_call(
        kernel,
        out_shape=jax.ShapeDtypeStruct((B * N, Fp), jnp.float32),
        grid_spec=pltpu.PrefetchScalarGridSpec(
            num_scalar_prefetch=0,
            grid=(grid,),
            in_specs=[
                pl.BlockSpec((tb * N, Fin), lambda b: (b, 0)),
                pl.BlockSpec((tb, N, N), lambda b: (b, 0, 0)),
                pl.BlockSpec((Fin, Fp), lambda b: (0, 0)),
                pl.BlockSpec((1, Fp), lambda b: (0, 0)),
                pl.BlockSpec((1, Fin), lambda b: (0, 0)),
            ],
            out_specs=pl.BlockSpec((tb * N, Fp), lambda b: (b, 0)),
        ),
        compiler_params=pltpu.CompilerParams(
            dimension_semantics=("parallel",),
            vmem_limit_bytes=64 * 1024 * 1024,              # explicit; safe on v5e/v6e/v7x
        ),
    )(h_flat, adj, W_ext, b_ext, wa1_row)

    # Strip lane padding (and the folded wh1 column) back to Fout.
    return out[:, :Fout].reshape(B, N, Fout)


def gat_reference(h, adj, W, bw, a, ab, *, alpha):
    """Pure-JAX mirror of the PyTorch forward (eval mode, concat=True)."""
    Wh = jnp.einsum("bnf,fo->bno", h, W) + bw[0]
    wh1 = jnp.einsum("bno,o->bn", Wh, a[0]) + ab[0]
    wh2 = jnp.einsum("bno,o->bn", Wh, a[1]) + ab[1]
    e = wh1[:, :, None] + wh2[:, None, :]
    e = jnp.where(e > 0, e, alpha * e)
    att = adj * e
    att = jax.nn.softmax(att, axis=2)
    h_hat = jnp.einsum("bnm,bmo->bno", att, Wh)
    return jnp.where(h_hat > 0, h_hat, jnp.expm1(h_hat))


def xavier_uniform(key, shape, fan_in, fan_out, gain):
    bound = gain * jnp.sqrt(6.0 / (fan_in + fan_out))
    return jax.random.uniform(key, shape, jnp.float32, -bound, bound)


if __name__ == "__main__":
    B, N, Fin, Fout = 4, 8, 16, 32
    alpha = 0.2  # LeakyReLU negative slope
    key = jax.random.PRNGKey(0)
    k_h, k_adj, k_w, k_bw, k_ai, k_aj, k_bai, k_baj = jax.random.split(key, 8)

    # inputs (adj stored as int8 in HBM; kernel casts once)
    h = jax.random.normal(k_h, (B, N, Fin), jnp.float32)
    adj = jax.random.bernoulli(k_adj, 0.5, (B, N, N)).astype(jnp.int8)

    # parameters (PyTorch-equivalent shapes; Wlinear.weight stored transposed)
    W = xavier_uniform(k_w, (Fin, Fout), Fin, Fout, 1.414)
    bw = jax.random.uniform(k_bw, (1, Fout), jnp.float32,
                            -1.0 / jnp.sqrt(Fin), 1.0 / jnp.sqrt(Fin))
    ai_w = xavier_uniform(k_ai, (Fout,), Fout, 1, 1.414)
    aj_w = xavier_uniform(k_aj, (Fout,), Fout, 1, 1.414)
    a = jnp.stack([ai_w, aj_w], axis=0)
    ab = jnp.stack([
        jax.random.uniform(k_bai, (), jnp.float32,
                           -1.0 / jnp.sqrt(Fout), 1.0 / jnp.sqrt(Fout)),
        jax.random.uniform(k_baj, (), jnp.float32,
                           -1.0 / jnp.sqrt(Fout), 1.0 / jnp.sqrt(Fout)),
    ])

    out = graph_attention_layer(h, adj, W, bw, a, ab, alpha=alpha)
    out = jax.block_until_ready(out)

    ref = gat_reference(h, adj.astype(jnp.float32), W, bw, a, ab, alpha=alpha)
    assert out.shape == (B, N, Fout)
    assert jnp.allclose(out, ref, rtol=1e-4, atol=1e-4), "mismatch vs JAX reference"

    print("KERNEL_OK")
</pallas_src>

<mosaic_0001>
module attributes {stable_mosaic.version = 11 : i64} {
  func.func @gat_kernel(%arg0: i32, %arg1: memref<16x16xf32, #tpu.memory_space<vmem>>, %arg2: memref<2x8x8xi8, #tpu.memory_space<vmem>>, %arg3: memref<16x128xf32, #tpu.memory_space<vmem>>, %arg4: memref<1x128xf32, #tpu.memory_space<vmem>>, %arg5: memref<1x16xf32, #tpu.memory_space<vmem>>, %arg6: memref<16x128xf32, #tpu.memory_space<vmem>>) attributes {dimension_semantics = [#tpu.dimension_semantics<parallel>], iteration_bounds = array<i64: 2>, scalar_prefetch = 0 : i64, scratch_operands = 0 : i64, tpu.core_type = #tpu.core_type<tc>, window_params = [{transform_indices = @transform_0, window_bounds = array<i64: 16, 16>}, {transform_indices = @transform_1, window_bounds = array<i64: 2, 8, 8>}, {pipeline_mode = #tpu.pipeline_mode<synchronous>, transform_indices = @transform_2, window_bounds = array<i64: 16, 128>}, {pipeline_mode = #tpu.pipeline_mode<synchronous>, transform_indices = @transform_3, window_bounds = array<i64: 1, 128>}, {pipeline_mode = #tpu.pipeline_mode<synchronous>, transform_indices = @transform_4, window_bounds = array<i64: 1, 16>}, {transform_indices = @transform_5, window_bounds = array<i64: 16, 128>}]} {
    %c0 = arith.constant 0 : index
    %c0_0 = arith.constant 0 : index
    %0 = vector.load %arg1[%c0, %c0_0] : memref<16x16xf32, #tpu.memory_space<vmem>>, vector<16x16xf32>
    %c0_1 = arith.constant 0 : index
    %c0_2 = arith.constant 0 : index
    %1 = vector.load %arg3[%c0_1, %c0_2] : memref<16x128xf32, #tpu.memory_space<vmem>>, vector<16x128xf32>
    %cst = arith.constant dense<0.000000e+00> : vector<16x128xf32>
    %2 = tpu.matmul %0, %1, %cst {dimension_numbers = #tpu.dot_dimension_numbers<[1], [0], [0], [1], [0, 0, 1, 1], [], []>} : vector<16x16xf32>, vector<16x128xf32>, vector<16x128xf32> -> vector<16x128xf32>
    %c0_3 = arith.constant 0 : index
    %c0_4 = arith.constant 0 : index
    %3 = vector.load %arg4[%c0_3, %c0_4] : memref<1x128xf32, #tpu.memory_space<vmem>>, vector<1x128xf32>
    %4 = vector.broadcast %3 : vector<1x128xf32> to vector<16x128xf32>
    %5 = arith.addf %2, %4 : vector<16x128xf32>
    %c0_5 = arith.constant 0 : index
    %c0_6 = arith.constant 0 : index
    %6 = vector.load %arg5[%c0_5, %c0_6] : memref<1x16xf32, #tpu.memory_space<vmem>>, vector<1x16xf32>
    %cst_7 = arith.constant dense<0.000000e+00> : vector<1x16xf32>
    %7 = tpu.matmul %6, %0, %cst_7 {dimension_numbers = #tpu.dot_dimension_numbers<[1], [1], [0], [0], [0, 0, 1, 0], [], []>} : vector<1x16xf32>, vector<16x16xf32>, vector<1x16xf32> -> vector<1x16xf32>
    %c0_8 = arith.constant 0 : index
    %c0_9 = arith.constant 0 : index
    %c0_10 = arith.constant 0 : index
    %8 = vector.load %arg2[%c0_8, %c0_9, %c0_10] : memref<2x8x8xi8, #tpu.memory_space<vmem>>, vector<2x8x8xi8>
    %9 = arith.sitofp %8 : vector<2x8x8xi8> to vector<2x8x8xf32>
    %10 = vector.extract_strided_slice %5 {offsets = [0, 0], sizes = [8, 128], strides = [1, 1]} : vector<16x128xf32> to vector<8x128xf32>
    %11 = vector.extract_strided_slice %10 {offsets = [0, 32], sizes = [8, 1], strides = [1, 1]} : vector<8x128xf32> to vector<8x1xf32>
    %12 = vector.extract_strided_slice %7 {offsets = [0, 0], sizes = [1, 8], strides = [1, 1]} : vector<1x16xf32> to vector<1x8xf32>
    %13 = vector.broadcast %11 : vector<8x1xf32> to vector<8x8xf32>
    %14 = vector.broadcast %12 : vector<1x8xf32> to vector<8x8xf32>
    %15 = arith.addf %13, %14 : vector<8x8xf32>
    %cst_11 = arith.constant 0.000000e+00 : f32
    %16 = vector.broadcast %cst_11 : f32 to vector<8x8xf32>
    %17 = arith.cmpf ogt, %15, %16 : vector<8x8xf32>
    %cst_12 = arith.constant 2.000000e-01 : f32
    %18 = vector.broadcast %cst_12 : f32 to vector<8x8xf32>
    %19 = arith.mulf %18, %15 : vector<8x8xf32>
    %20 = arith.select %17, %15, %19 : vector<8x8xi1>, vector<8x8xf32>
    %21 = vector.extract_strided_slice %9 {offsets = [0, 0, 0], sizes = [1, 8, 8], strides = [1, 1, 1]} : vector<2x8x8xf32> to vector<1x8x8xf32>
    %22 = vector.shape_cast %21 : vector<1x8x8xf32> to vector<8x8xf32>
    %23 = arith.mulf %22, %20 : vector<8x8xf32>
    %cst_13 = arith.constant dense<0xFF800000> : vector<8xf32>
    %24 = vector.multi_reduction <maximumf>, %23, %cst_13 [1] : vector<8x8xf32> to vector<8xf32>
    %25 = vector.shape_cast %24 : vector<8xf32> to vector<8x1xf32>
    %26 = vector.broadcast %25 : vector<8x1xf32> to vector<8x8xf32>
    %27 = arith.subf %23, %26 : vector<8x8xf32>
    %28 = math.exp %27 : vector<8x8xf32>
    %cst_14 = arith.constant dense<0.000000e+00> : vector<8xf32>
    %29 = vector.multi_reduction <add>, %28, %cst_14 [1] : vector<8x8xf32> to vector<8xf32>
    %30 = vector.shape_cast %29 : vector<8xf32> to vector<8x1xf32>
    %cst_15 = arith.constant dense<0.000000e+00> : vector<8x128xf32>
    %31 = tpu.matmul %28, %10, %cst_15 {dimension_numbers = #tpu.dot_dimension_numbers<[1], [0], [0], [1], [0, 0, 1, 1], [], []>} : vector<8x8xf32>, vector<8x128xf32>, vector<8x128xf32> -> vector<8x128xf32>
    %32 = tpu.reciprocal %30 : vector<8x1xf32> -> vector<8x1xf32>
    %33 = vector.broadcast %32 : vector<8x1xf32> to vector<8x128xf32>
    %34 = arith.mulf %31, %33 : vector<8x128xf32>
    %cst_16 = arith.constant 0.000000e+00 : f32
    %35 = vector.broadcast %cst_16 : f32 to vector<8x128xf32>
    %36 = arith.cmpf ogt, %34, %35 : vector<8x128xf32>
    %37 = math.exp %34 : vector<8x128xf32>
    %cst_17 = arith.constant 1.000000e+00 : f32
    %38 = vector.broadcast %cst_17 : f32 to vector<8x128xf32>
    %39 = arith.subf %37, %38 : vector<8x128xf32>
    %40 = arith.select %36, %34, %39 : vector<8x128xi1>, vector<8x128xf32>
    %c0_18 = arith.constant 0 : index
    %c0_19 = arith.constant 0 : index
    %41 = vector.load %arg6[%c0_18, %c0_19] : memref<16x128xf32, #tpu.memory_space<vmem>>, vector<8x128xf32>
    tpu.vector_store %arg6[%c0_18, %c0_19], %40 {strides = array<i32>} : memref<16x128xf32, #tpu.memory_space<vmem>>, vector<8x128xf32>,
    %42 = vector.extract_strided_slice %5 {offsets = [8, 0], sizes = [8, 128], strides = [1, 1]} : vector<16x128xf32> to vector<8x128xf32>
    %43 = vector.extract_strided_slice %42 {offsets = [0, 32], sizes = [8, 1], strides = [1, 1]} : vector<8x128xf32> to vector<8x1xf32>
    %44 = vector.extract_strided_slice %7 {offsets = [0, 8], sizes = [1, 8], strides = [1, 1]} : vector<1x16xf32> to vector<1x8xf32>
    %45 = vector.broadcast %43 : vector<8x1xf32> to vector<8x8xf32>
    %46 = vector.broadcast %44 : vector<1x8xf32> to vector<8x8xf32>
    %47 = arith.addf %45, %46 : vector<8x8xf32>
    %cst_20 = arith.constant 0.000000e+00 : f32
    %48 = vector.broadcast %cst_20 : f32 to vector<8x8xf32>
    %49 = arith.cmpf ogt, %47, %48 : vector<8x8xf32>
    %cst_21 = arith.constant 2.000000e-01 : f32
    %50 = vector.broadcast %cst_21 : f32 to vector<8x8xf32>
    %51 = arith.mulf %50, %47 : vector<8x8xf32>
    %52 = arith.select %49, %47, %51 : vector<8x8xi1>, vector<8x8xf32>
    %53 = vector.extract_strided_slice %9 {offsets = [1, 0, 0], sizes = [1, 8, 8], strides = [1, 1, 1]} : vector<2x8x8xf32> to vector<1x8x8xf32>
    %54 = vector.shape_cast %53 : vector<1x8x8xf32> to vector<8x8xf32>
    %55 = arith.mulf %54, %52 : vector<8x8xf32>
    %cst_22 = arith.constant dense<0xFF800000> : vector<8xf32>
    %56 = vector.multi_reduction <maximumf>, %55, %cst_22 [1] : vector<8x8xf32> to vector<8xf32>
    %57 = vector.shape_cast %56 : vector<8xf32> to vector<8x1xf32>
    %58 = vector.broadcast %57 : vector<8x1xf32> to vector<8x8xf32>
    %59 = arith.subf %55, %58 : vector<8x8xf32>
    %60 = math.exp %59 : vector<8x8xf32>
    %cst_23 = arith.constant dense<0.000000e+00> : vector<8xf32>
    %61 = vector.multi_reduction <add>, %60, %cst_23 [1] : vector<8x8xf32> to vector<8xf32>
    %62 = vector.shape_cast %61 : vector<8xf32> to vector<8x1xf32>
    %cst_24 = arith.constant dense<0.000000e+00> : vector<8x128xf32>
    %63 = tpu.matmul %60, %42, %cst_24 {dimension_numbers = #tpu.dot_dimension_numbers<[1], [0], [0], [1], [0, 0, 1, 1], [], []>} : vector<8x8xf32>, vector<8x128xf32>, vector<8x128xf32> -> vector<8x128xf32>
    %64 = tpu.reciprocal %62 : vector<8x1xf32> -> vector<8x1xf32>
    %65 = vector.broadcast %64 : vector<8x1xf32> to vector<8x128xf32>
    %66 = arith.mulf %63, %65 : vector<8x128xf32>
    %cst_25 = arith.constant 0.000000e+00 : f32
    %67 = vector.broadcast %cst_25 : f32 to vector<8x128xf32>
    %68 = arith.cmpf ogt, %66, %67 : vector<8x128xf32>
    %69 = math.exp %66 : vector<8x128xf32>
    %cst_26 = arith.constant 1.000000e+00 : f32
    %70 = vector.broadcast %cst_26 : f32 to vector<8x128xf32>
    %71 = arith.subf %69, %70 : vector<8x128xf32>
    %72 = arith.select %68, %66, %71 : vector<8x128xi1>, vector<8x128xf32>
    %c8 = arith.constant 8 : index
    %c0_27 = arith.constant 0 : index
    %73 = vector.load %arg6[%c8, %c0_27] : memref<16x128xf32, #tpu.memory_space<vmem>>, vector<8x128xf32>
    tpu.vector_store %arg6[%c8, %c0_27], %72 {strides = array<i32>} : memref<16x128xf32, #tpu.memory_space<vmem>>, vector<8x128xf32>,
    return
  }
  func.func @transform_0(%arg0: i32) -> (i32, i32) {
    %c0_i32 = arith.constant 0 : i32
    %c0_i32_0 = arith.constant 0 : i32
    return %arg0, %c0_i32 : i32, i32
  }
  func.func @transform_1(%arg0: i32) -> (i32, i32, i32) {
    %c0_i32 = arith.constant 0 : i32
    %c0_i32_0 = arith.constant 0 : i32
    %c0_i32_1 = arith.constant 0 : i32
    return %arg0, %c0_i32, %c0_i32_0 : i32, i32, i32
  }
  func.func @transform_2(%arg0: i32) -> (i32, i32) {
    %c0_i32 = arith.constant 0 : i32
    %c0_i32_0 = arith.constant 0 : i32
    %c0_i32_1 = arith.constant 0 : i32
    return %c0_i32, %c0_i32_0 : i32, i32
  }
  func.func @transform_3(%arg0: i32) -> (i32, i32) {
    %c0_i32 = arith.constant 0 : i32
    %c0_i32_0 = arith.constant 0 : i32
    %c0_i32_1 = arith.constant 0 : i32
    return %c0_i32, %c0_i32_0 : i32, i32
  }
  func.func @transform_4(%arg0: i32) -> (i32, i32) {
    %c0_i32 = arith.constant 0 : i32
    %c0_i32_0 = arith.constant 0 : i32
    %c0_i32_1 = arith.constant 0 : i32
    return %c0_i32, %c0_i32_0 : i32, i32
  }
  func.func @transform_5(%arg0: i32) -> (i32, i32) {
    %c0_i32 = arith.constant 0 : i32
    %c0_i32_0 = arith.constant 0 : i32
    return %arg0, %c0_i32 : i32, i32
  }
}

</mosaic_0001>

<bundles_post_ra>
// kernel: tpu_custom_call.1
= control target key start
LH: loop header
LB: loop body
LE: loop exit
PB: predicated region body
PF: predicated region fallthrough
CT: control target
= control target key end

     0   :  { %s1645_s0 = inlined_call_operand.hbm [shape: f32[32,16], index: 0, kind: input, shape index: {}]   ;;  %s1646_s1 = inlined_call_operand.hbm [shape: s8[4,8,8], index: 1, kind: input, shape index: {}]   ;;  %s1647_s2 = inlined_call_operand.hbm [shape: f32[16,128], index: 2, kind: input, shape index: {}]   ;;  %s1648_s3 = inlined_call_operand.hbm [shape: f32[1,128], index: 3, kind: input, shape index: {}]   ;;  %s1649_s4 = inlined_call_operand.hbm [shape: f32[1,16], index: 4, kind: input, shape index: {}]   ;;  %s1650_s5 = inlined_call_operand.hbm [shape: f32[32,128], index: 5, kind: output, shape index: {}]  }
   0x1   :  { %1654 = sst [smem:[#allocation17_spill]] %s1645_s0 }
   0x2   :  { %1655 = sst [smem:[#allocation18_spill]] %s1647_s2 }
   0x3   :  { %1656 = sst [smem:[#allocation19_spill]] %s1648_s3 }
   0x4   :  { %10 = vsyncpa [#allocation3], 0 }
   0x5   :  { %12 = vsyncpa [#allocation3 + $0x1], 0 }
   0x6   :  { %13 = vsyncpa [#allocation6], 0 }
   0x7   :  { %15 = vsyncpa [#allocation6 + $0x1], 0 }
   0x8   :  { %16 = vsyncpa [#allocation9], 0 }
   0x9   :  { %17 = vsyncpa [#allocation4], 0 }
   0xa   :  { %19 = vsyncpa [#allocation4 + $0x1], 0  ;;  %s1306_s18 = smov 0   ;;  %s1308_s19 = smov 0  }
   0xb   :  { %s1310_s20 = smov 0   ;;  %s1312_s21 = smov 0  }
   0xc LB: > { %s1327_s22 = sadd.s32 4294967295, %s1257_s21   ;;  %s845_s23 = sadd.s32 4294967294, %s1257_s21   ;;  %s1257_s21 = sphi %s1312_s21, %s1680_s21   ;;  %s1253_s20 = sphi %s1310_s20, %s1679_s20   ;;  %s1249_s19 = sphi %s1308_s19, %s1678_s19   ;;  %s1245_s18 = sphi %s1306_s18, %s1677_s18  }
   0xd   : > { %p45_p0 = scmp.ne.s32.totalorder %s1249_s19, %s1245_s18  ;;  %p1651_p1 = scmp.eq.s32.totalorder %s1327_s22, 0 }
   0xe   : > { %p164_p3 = scmp.eq.s32.totalorder %s845_s23, 1  ;;  %p846_p5 = scmp.ge.s32.totalorder %s1257_s21, 1 }
   0xf   : > { %p1336_p4 = por %p1651_p1, %p45_p0  ;;  %p171_p7 = scmp.lt.s32.totalorder %s1257_s21, 3 }
  0x10   : > { %p1341_p6 = por %p164_p3, %p45_p0  ;;  %s1259_s27 = smov [#allocation7]  }
  0x11   : > { %s1657_s24 = scalar_select %p1336_p4, 1, 0 }
  0x12   : > { %s1658_s25 = scalar_select %p1341_p6, 1, 0 }
  0x13   : > { %p1346_p8 = pnand %p846_p5, %p171_p7  ;;  %s183_s28 = sshll.u32 %s1259_s27, 4  ;;  %s1350_s28 = int_to_ptr.vmem [resolvable:$true] %s183_s28 }
  0x14   : > { %s1260_s30 = smov [#allocation8]   ;;  %s1261_s7 = smov [#allocation10]  }
  0x15   : > { %s1659_s26 = scalar_select %p1346_p8, 1, 0 }
  0x16   : > { %p947_p9 = pneg %p1346_p8  ;;  %s197_s6 = sshll.u32 %s1260_s30, 4  ;;  %s1361_s6 = int_to_ptr.vmem [resolvable:$true] %s197_s6 }
  0x17   : > { %s1363_s8 = sshll.u32 %s1261_s7, 4  ;;  %s1661_s2 = sld [smem:[#allocation18_spill]]  ;;  %s209_s8 = int_to_ptr.vmem [resolvable:$true] %s1363_s8 }
  0x18   : > { %p1357_p11 = pnand %p947_p9, %p1651_p1 }
  0x1a   : > { %p1373_p13 = pneg %p1357_p11 }
  0x1d   : > { %s1035_s11 = scalar_lea.hbm %s1661_s2, 256 }
  0x1e   : > { %p1036_p12 = scmp.ne.s32.totalorder %s1661_s2, %s1035_s11  ;;  %p1042_p5 = scmp.lt.u32.totalorder %s1035_s11, %s1661_s2 }
  0x20   : > { %p1038_p0 = pnand %p1373_p13, %p1036_p12 }
  0x22   : > { %p1039_p3 = pneg %p1038_p0 }
  0x24   : > { %p1044_p7 = pnand %p1042_p5, %p1039_p3 }
  0x26   : > { %1047 = shalt.err (!%p1044_p7)
}
  0x27   : > { %s1048_s17 = scalar_lea.vmem %s1350_s28, 256  ;;  %p1056_p2 = scmp.lt.s32.totalorder %s1350_s28, %s1350_s28 }
  0x28   : > { %p1049_p9 = scmp.ne.s32.totalorder %s1350_s28, %s1048_s17  ;;  %p1057_p6 = scmp.lt.s32.totalorder %s1048_s17, %s1048_s17 }
  0x2a   : > { %p1051_p10 = pnand %p1049_p9, %p1373_p13  ;;  %p1058_p12 = por %p1057_p6, %p1056_p2 }
  0x2c   : > { %p1052_p1 = pneg %p1051_p10 }
  0x2e   : > { %p1059_p0 = pnand %p1058_p12, %p1052_p1 }
  0x30   : > { %1062 = shalt.err (!%p1059_p0)
}
  0x31   : > { %s1262_s23 = smov 128   ;;  %s1263_s27 = smov 8  }
  0x32   : > { %950 = dma.hbm_to_vmem [thread:$0]  (!%p1357_p11), %s1661_s2, 256, %s1350_s28, [#allocation6], %s1262_s23, %s1262_s23, %s1263_s27  }
  0x33   : > { %s1663_s3 = sld [smem:[#allocation19_spill]] }
  0x39   : > { %s1063_s11 = scalar_lea.hbm %s1663_s3, 16 }
  0x3a   : > { %p1064_p1 = scmp.ne.s32.totalorder %s1663_s3, %s1063_s11  ;;  %p1070_p10 = scmp.lt.u32.totalorder %s1063_s11, %s1663_s3 }
  0x3c   : > { %p1066_p2 = pnand %p1064_p1, %p1373_p13 }
  0x3e   : > { %p1067_p6 = pneg %p1066_p2 }
  0x40   : > { %p1072_p3 = pnand %p1070_p10, %p1067_p6 }
  0x42   : > { %1075 = shalt.err (!%p1072_p3)
}
  0x43   : > { %s1076_s28 = scalar_lea.vmem %s1361_s6, 16  ;;  %s1083_s17 = scalar_lea.vmem %s1361_s6, 32 }
  0x44   : > { %p1077_p5 = scmp.ne.s32.totalorder %s1361_s6, %s1076_s28  ;;  %p1084_p12 = scmp.lt.s32.totalorder %s1361_s6, %s1361_s6 }
  0x45   : > { %p1085_p0 = scmp.lt.s32.totalorder %s1083_s17, %s1076_s28 }
  0x46   : > { %p1079_p7 = pnand %p1077_p5, %p1373_p13 }
  0x47   : > { %p1086_p1 = por %p1085_p0, %p1084_p12 }
  0x48   : > { %p1080_p9 = pneg %p1079_p7 }
  0x4a   : > { %p1087_p2 = pnand %p1086_p1, %p1080_p9 }
  0x4c   : > { %1090 = shalt.err (!%p1087_p2)
}
  0x4d   : > { %953 = dma.hbm_to_vmem [thread:$0]  (!%p1357_p11), %s1663_s3, 16, %s1361_s6, [#allocation9]  }
  0x4e   : > { %s1091_s11 = scalar_lea.hbm %s1649_s4, 16 }
  0x4f   : > { %p1092_p6 = scmp.ne.s32.totalorder %s1649_s4, %s1091_s11  ;;  %p1098_p5 = scmp.lt.u32.totalorder %s1091_s11, %s1649_s4 }
  0x51   : > { %p1094_p10 = pnand %p1092_p6, %p1373_p13 }
  0x53   : > { %p1095_p3 = pneg %p1094_p10 }
  0x55   : > { %p1100_p7 = pnand %p1098_p5, %p1095_p3 }
  0x57   : > { %1103 = shalt.err (!%p1100_p7)
}
  0x58   : > { %s1104_s28 = scalar_lea.vmem %s209_s8, 16  ;;  %s1111_s6 = scalar_lea.vmem %s209_s8, 32 }
  0x59   : > { %p1105_p9 = scmp.ne.s32.totalorder %s209_s8, %s1104_s28  ;;  %p1112_p1 = scmp.lt.s32.totalorder %s209_s8, %s209_s8 }
  0x5a   : > { %p1113_p2 = scmp.lt.s32.totalorder %s1111_s6, %s1104_s28 }
  0x5b   : > { %p1107_p12 = pnand %p1105_p9, %p1373_p13 }
  0x5c   : > { %p1114_p4 = por %p1113_p2, %p1112_p1 }
  0x5d   : > { %p1108_p0 = pneg %p1107_p12 }
  0x5f   : > { %p1115_p8 = pnand %p1114_p4, %p1108_p0 }
  0x61   : > { %1118 = shalt.err (!%p1115_p8)
}
  0x62   : > { %956 = dma.hbm_to_vmem [thread:$0]  (!%p1357_p11), %s1649_s4, 16, %s209_s8, [#allocation9]  }
  0x63   : > { %s1441_s14 = sadd.s32 1, %s1257_s21   ;;  %s32_s29 = sadd.s32 1, %s1253_s20 }
  0x64   : > { %s29_s7 = ssub.s32 %s1257_s21, %s1441_s14  ;;  %p39_p8 = scmp.ne.s32.totalorder %s1253_s20, %s1249_s19 }
  0x65   : > { %p30_p4 = scmp.eq.s32.totalorder %s29_s7, 0  ;;  %p40_p13 = scmp.eq.s32.totalorder %s1257_s21, 0 }
  0x66   : > { %p971_p6 = scmp.lt.s32.totalorder %s1257_s21, 2  ;;  %p1664_p3 = scmp.eq.s32.totalorder %s1327_s22, 1 }
  0x67   : > { %s1451_s9 = scalar_select %p30_p4, %s1253_s20, %s32_s29  }
  0x68   : > { %p41_p10 = por %p40_p13, %p39_p8  ;;  %p1455_p5 = por %p1664_p3, %p39_p8 }
  0x69   : > { %s1460_s11 = sand.u32 1, %s1253_s20   ;;  %s879_s8 = sshll.u32 %s1257_s21, 8 }
  0x6a   : > { %s851_s12 = sshll.u32 %s1460_s11, 4  ;;  %s1666_s0 = sld [smem:[#allocation17_spill]] }
  0x6b   : > { %s223_s28 = scalar_lea.vmem [#allocation2], %s851_s12  ;;  %p1469_p11 = pnand %p971_p6, %p41_p10 }
  0x6c   : > { %s230_s6 = sshll.u32 %s223_s28, 4  ;;  %s220_s7 = scalar_lea.sflag [#allocation3], %s1460_s11  ;;  %s1473_s6 = int_to_ptr.vmem [resolvable:$true] %s230_s6 }
  0x6d   : > { %p1121_p9 = pneg %p1469_p11 }
  0x70   : > { %s1467_s16 = scalar_lea.hbm %s1666_s0, %s879_s8  ;;  %s1124_s13 = scalar_lea.hbm %s1666_s0, 512 }
  0x71   : > { %s1119_s29 = scalar_lea.hbm %s1467_s16, 256  ;;  %p1125_p1 = scmp.lt.u32.totalorder %s1467_s16, %s1666_s0 }
  0x72   : > { %p1120_p7 = scmp.ne.s32.totalorder %s1467_s16, %s1119_s29  ;;  %p1126_p2 = scmp.lt.u32.totalorder %s1124_s13, %s1119_s29 }
  0x73   : > { %p1128_p8 = scmp.lt.u32.totalorder %s1119_s29, %s1467_s16 }
  0x74   : > { %p1122_p12 = pnand %p1121_p9, %p1120_p7  ;;  %p1127_p4 = por %p1126_p2, %p1125_p1 }
  0x76   : > { %p1123_p0 = pneg %p1122_p12  ;;  %p1129_p13 = por %p1128_p8, %p1127_p4 }
  0x78   : > { %p1130_p6 = pnand %p1129_p13, %p1123_p0 }
  0x7a   : > { %1133 = shalt.err (!%p1130_p6)
}
  0x7b   : > { %s1134_s30 = scalar_lea.vmem %s1473_s6, 256  ;;  %s1264_s8 = smov [#allocation2]  }
  0x7c   : > { %p1135_p10 = scmp.ne.s32.totalorder %s1473_s6, %s1134_s30  ;;  %s1139_s12 = sshll.u32 %s1264_s8, 4  ;;  %s1140_s12 = int_to_ptr.vmem [resolvable:$false] %s1139_s12 }
  0x7d   : > { %s1141_s15 = scalar_lea.vmem %s1140_s12, 512  ;;  %p1142_p12 = scmp.lt.s32.totalorder %s1473_s6, %s1140_s12 }
  0x7e   : > { %p1137_p3 = pnand %p1135_p10, %p1121_p9  ;;  %p1143_p1 = scmp.lt.s32.totalorder %s1141_s15, %s1134_s30 }
  0x80   : > { %p1138_p7 = pneg %p1137_p3  ;;  %p1144_p2 = por %p1143_p1, %p1142_p12 }
  0x82   : > { %p1145_p4 = pnand %p1144_p2, %p1138_p7 }
  0x84   : > { %1148 = shalt.err (!%p1145_p4)
}
  0x85   : > { %960 = dma.hbm_to_vmem [thread:$0]  (!%p1469_p11), %s1467_s16, 256, %s1473_s6, %s220_s7, %s1262_s23, %s1262_s23, %s1263_s27  }
  0x86   : > { %s854_s29 = sshll.u32 %s1460_s11, 2  ;;  %s880_s13 = sshll.u32 %s1257_s21, 6 }
  0x87   : > { %s1512_s8 = scalar_lea.hbm %s1646_s1, %s880_s13  ;;  %s244_s12 = scalar_lea.vmem [#allocation5], %s854_s29 }
  0x88   : > { %s251_s15 = sshll.u32 %s244_s12, 4  ;;  %s1668_s0 = sand.u32 1, %s1257_s21   ;;  %s1514_s15 = int_to_ptr.vmem [resolvable:$true] %s251_s15 }
  0x89   : > { %s1518_s2 = scalar_lea.sflag [#allocation6], %s1668_s0  ;;  %s1149_s3 = scalar_lea.hbm %s1512_s8, 64 }
  0x8a   : > { %p1150_p0 = scmp.ne.s32.totalorder %s1512_s8, %s1149_s3  ;;  %s1154_s11 = scalar_lea.hbm %s1646_s1, 128 }
  0x8b   : > { %p1155_p6 = scmp.lt.u32.totalorder %s1512_s8, %s1646_s1  ;;  %p1156_p10 = scmp.lt.u32.totalorder %s1154_s11, %s1149_s3 }
  0x8c   : > { %p1152_p8 = pnand %p1150_p0, %p1121_p9  ;;  %p1158_p7 = scmp.lt.u32.totalorder %s1149_s3, %s1512_s8 }
  0x8d   : > { %p1157_p3 = por %p1156_p10, %p1155_p6 }
  0x8e   : > { %p1153_p13 = pneg %p1152_p8 }
  0x8f   : > { %p1159_p12 = por %p1158_p7, %p1157_p3 }
  0x91   : > { %p1160_p1 = pnand %p1159_p12, %p1153_p13 }
  0x93   : > { %1163 = shalt.err (!%p1160_p1)
}
  0x94   : > { %s1164_s0 = scalar_lea.vmem %s1514_s15, 64  ;;  %s1265_s7 = smov [#allocation5]  }
  0x95   : > { %p1165_p2 = scmp.ne.s32.totalorder %s1514_s15, %s1164_s0  ;;  %s1169_s29 = sshll.u32 %s1265_s7, 4  ;;  %s1170_s29 = int_to_ptr.vmem [resolvable:$false] %s1169_s29 }
  0x96   : > { %s1171_s13 = scalar_lea.vmem %s1170_s29, 128  ;;  %p1172_p8 = scmp.lt.s32.totalorder %s1514_s15, %s1170_s29 }
  0x97   : > { %p1167_p4 = pnand %p1165_p2, %p1121_p9  ;;  %p1173_p6 = scmp.lt.s32.totalorder %s1171_s13, %s1164_s0 }
  0x99   : > { %p1168_p0 = pneg %p1167_p4  ;;  %p1174_p10 = por %p1173_p6, %p1172_p8 }
  0x9b   : > { %p1175_p3 = pnand %p1174_p10, %p1168_p0 }
  0x9d   : > { %1178 = shalt.err (!%p1175_p3)
}
  0x9e   : > { %s1266_s3 = smov 32   ;;  %s1267_s30 = smov 2  }
  0x9f   : > { %963 = dma.hbm_to_vmem [thread:$0]  (!%p1469_p11), %s1512_s8, 64, %s1514_s15, %s1518_s2, %s1266_s3, %s1266_s3, %s1267_s30  }
  0xa0   : > { %p1669_p9 = scmp.ne.s32.totalorder %s1659_s26, 0 }
  0xa1   : > { %s1547_s28 = sand.u32 (!%p1669_p9), 1, %s1249_s19   ;;  %p1670_p13 = scmp.ne.s32.totalorder (!%p1669_p9), %s1657_s24, 0 }
  0xa2   : > { %263 = sbr.rel (%p1669_p9) target bundleno = 1055 (0x41f), region = 40  ;;  %s858_s12 = sshll.u32 (!%p1669_p9), %s1547_s28, 4 }
  0xa3   : > { %s266_s23 = scalar_lea.sflag (!%p1669_p9), [#allocation3], %s1547_s28  ;;  %s269_s27 = scalar_lea.vmem (!%p1669_p9), [#allocation2], %s858_s12 }
  0xa9   : > { %1224 = dma.done.wait (%p1670_p13), %s266_s23, 256  }
  0xaa   : > { %1226 = vsyncadd (%p1670_p13), %s266_s23, 4294967040  ;;  %s274_s2 = sand.u32 1, %s1327_s22   ;;  %s859_s26 = sshll.u32 %s1547_s28, 2 }
  0xab   : > { %s275_s17 = scalar_lea.sflag [#allocation6], %s274_s2  ;;  %s1559_s8 = scalar_lea.vmem [#allocation5], %s859_s26 }
  0xac   : > { %1228 = dma.done.wait (%p1670_p13), %s275_s17, 64  }
  0xad   : > { %1230 = vsyncadd (%p1670_p13), %s275_s17, 4294967232  ;;  %p1671_p11 = scmp.eq.s32.totalorder %s1327_s22, 0 }
  0xaf   : > { %1232 = dma.done.wait (%p1671_p11), [#allocation6], 256   ;;  %p1672_p7 = pmov %p1671_p11 }
  0xb1   : > { %1234 = vsyncadd (%p1672_p7), [#allocation6], 4294967040  ;;  %p1673_p12 = pmov %p1672_p7 }
  0xb2   : > { %p1674_p1 = pmov %p1672_p7 }
  0xb3   : > { %1236 = dma.done.wait (%p1673_p12), [#allocation9], 32  }
  0xb4   : > { %1238 = vsyncadd (%p1674_p1), [#allocation9], 4294967264  ;;  %v1268_v0 = vmov 0.0|0.0   ;;  %vm1269_vm0 = vmmov 0   ;;  %v1270_v1 = vmov 0.0   ;;  %vm336_vm1 = vcmask 130048  }
  0xb5   : > { %925 = vmatprep.subr.bf16.mxu1 %v1268_v0  ;;  %908 = vmatprep.mubr.msk.f32.mxu1 %vm1269_vm0, %v1270_v1  ;;  %v327_v2 = vld [vmem:[#allocation7] sm:$0xff]  ;;  %v328_v3 = vld [vmem:[#allocation7 + $0x8] sm:$0xff]  ;;  %vm927_vm2 = vmpackc.low %vm336_vm1, %vm336_vm1  ;;  %v1271_v9 = vmov 32   ;;  %v503_v17 = vlaneseq  ;;  %s1272_s24 = smov 120   ;;  %vm512_vm5 = vcmask 64512   ;;  %s321_s15 = scalar_lea.vmem [#allocation11], %s858_s12 }
  0xb6   : > { %v325_v4 = vld [vmem:[%s269_s27] sm:$0xff]  ;;  %v921_v5 = vpack.c.bf16 %v328_v3, %v327_v2  ;;  %v326_v6 = vld [vmem:[%s269_s27 + $0x8] sm:$0xff]  ;;  %1022 = vset.pattern.permute.xlu0 %v1271_v9  ;;  %s721_s11 = sshll.u32 %s321_s15, 4  ;;  %s881_s16 = sshll.u32 %s1327_s22, 8  ;;  %s1596_s11 = int_to_ptr.vmem [resolvable:$true] %s721_s11 }
  0xb7   : > { %901 = vmatprep.mubr.msk.f32.mxu0 %vm336_vm1, %v325_v4  ;;  %v926_v7 = vpack.c.bf16 %v326_v6, %v325_v4  ;;  %v418_v8 = vld [vmem:[#allocation10] sm:$0x1]  ;;  %v864_v10 = vld [vmem:[#allocation8] ss:$0 sm:$0xff]  ;;  %v504_v18 = vshrl.u32 %v503_v17, 7  ;;  %s1601_s7 = scalar_lea.hbm %s1650_s5, %s881_s16  ;;  %s708_s29 = scalar_lea.sflag [#allocation4], %s1547_s28 }
  0xb8   : > { %922 = vmatprep.subr.bf16.mxu0 %v921_v5  ;;  %v883_v27 = vld [vmem:[%s1559_s8] sm:$0xf]   ;;  %s1179_s13 = scalar_lea.vmem %s1596_s11, 256  ;;  %s1273_s22 = smov [#allocation11]  }
  0xb9   : > { %924 = vmatpush3.bf16.msra.mxu0 %v921_v5  ;;  %928 = vmatpush3.bf16.xpose.msk.msra.mxu1 %vm927_vm2, %v926_v7  ;;  %v505_v19 = vsub.s32 0, %v504_v18  ;;  %v884_v28 = vunpack.c.0.s8 %v883_v27  ;;  %v885_v34 = vunpack.c.1.s8 %v883_v27  ;;  %p1180_p2 = scmp.ne.s32.totalorder %s1596_s11, %s1179_s13  ;;  %s1183_s3 = sshll.u32 %s1273_s22, 4  ;;  %s1184_s3 = int_to_ptr.vmem [resolvable:$false] %s1183_s3 }
  0xba   : > { %911 = vmatprep.subr.mxu0 %v1270_v1  ;;  %s1185_s30 = scalar_lea.vmem %s1184_s3, 512  ;;  %p1186_p8 = scmp.lt.s32.totalorder %s1596_s11, %s1184_s3 }
  0xbb   : > { %v496_v30 = vcvt.s32.f32 %v884_v28  ;;  %v497_v35 = vcvt.s32.f32 %v885_v34  ;;  %p1181_p4 = pnand %p1180_p2, %p1455_p5  ;;  %p1187_p6 = scmp.lt.s32.totalorder %s1185_s30, %s1179_s13 }
  0xbc   : > { %902 = vmatmul.mubr.msk.f32.vlgmr.msra.gmra.mrb[0].mxu0 %vm336_vm1, %v326_v6 }
  0xbd   : > { %913 = vmatprep.mubr.msk.f32.mxu0 %vm1269_vm0, %v1270_v1  ;;  %p1182_p0 = pneg %p1181_p4  ;;  %p1188_p10 = por %p1187_p6, %p1186_p8 }
  0xbf   : > { %p1189_p3 = pnand %p1188_p10, %p1182_p0 }
  0xc0   : > { %909 = vmatmul.mubr.msk.f32.vlgmr.msra.gmra.mrb[0].mxu1 %vm336_vm1, %v418_v8 }
 0x18f   : > { %v903_v11 = vpop.f32.mrb[0].mxu0 }
 0x190   : > { %v415_v12 = vadd.f32 %v903_v11, %v864_v10  ;;  %v409_v13 = vpop.f32.mrb[1].mxu0 }
 0x191   : > { %v410_v14 = vadd.f32 %v864_v10, %v409_v13 }
 0x192   : > { %605 = vperm.xlu0 %1022, %v415_v12  }
 0x193   : > { %912 = vmatpush3.msra.mxu0 %v410_v14  ;;  %v488_v15 = vpop.f32.mrb[0].mxu1 }
 0x194   : > { %v910_v16 = vpop.f32.mrb[1].mxu1  ;;  %916 = vmatprep.subr.mxu0 %v1270_v1  ;;  %v506_v20 = vrot.slane %v488_v15, %v505_v19 }
 0x196   : > { %500 = vperm.xlu0 %1022, %v410_v14  }
 0x211   : > { %v606_v21 = vpop.permute.xlu0 %605 }
 0x212   : > { %v608_v22 = vadd.f32 %v606_v21, %v506_v20 }
 0x214   : > { %vm609_vm3 = vcmp.gt.f32.partialorder %v608_v22, 0.0  ;;  %v610_v23 = vmul.f32 0.2, %v608_v22 }
 0x215   : > { %v501_v25 = vpop.permute.xlu0 %500 }
 0x216   : > { %v611_v24 = vsel %vm609_vm3, %v608_v22, %v610_v23  ;;  %v507_v26 = vadd.f32 %v506_v20, %v501_v25 }
 0x217   : > { %613 = vrot.lane.b32.xlu1 %v611_v24, %s1272_s24 }
 0x218   : > { %v509_v29 = vmul.f32 0.2, %v507_v26  ;;  %vm508_vm4 = vcmp.gt.f32.partialorder %v507_v26, 0.0 }
 0x21a   : > { %v510_v31 = vsel %vm508_vm4, %v507_v26, %v509_v29 }
 0x21b   : > { %v511_v32 = vmul.f32 %v510_v31, %v496_v30 }
 0x21d   : > { %v513_v33 = vsel %vm512_vm5, %v511_v32, -inf }
 0x23b   : > { %514 = vmax.xlane.f32.xlu1 %v513_v33 }
 0x289   : > { %v614_v36 = vpop.permute.xlu1 %613 }
 0x28a   : > { %v616_v37 = vmul.f32 %v614_v36, %v497_v35 }
 0x28c   : > { %v617_v38 = vsel %vm512_vm5, %v616_v37, -inf }
 0x28d   : > { %618 = vmax.xlane.f32.xlu0 %v617_v38 }
 0x2c8   : > { %v515_v39 = vpop.xlane.xlu1 %514 }
 0x2c9   : > { %v516_v40 = vsub.f32 %v511_v32, %v515_v39 }
 0x2cb   : > { %v517_v41 = vmul.f32 1.442695, %v516_v40 }
 0x2cd   : > { %1023 = vpow2.f32 %v517_v41 }
 0x2d7   : > { %v1024_v42 = vpop.eup %1023 }
 0x2d8   : > { %914 = vmatmul.mubr.msk.f32.vlgmr.msra.gmra.mrb[2].mxu0 %vm512_vm5, %v1024_v42  ;;  %v519_v43 = vsel %vm512_vm5, %v1024_v42, 0.0 }
 0x2d9   : > { %917 = vmatpush3.msra.mxu0 %v415_v12  ;;  %520 = vadd.xlane.f32.xlu0 %v519_v43 }
 0x2da   : > { %918 = vmatprep.mubr.msk.f32.mxu0 %vm1269_vm0, %v1270_v1 }
 0x31a   : > { %v619_v44 = vpop.xlane.xlu0 %618 }
 0x31b   : > { %v620_v45 = vsub.f32 %v616_v37, %v619_v44 }
 0x31d   : > { %v621_v46 = vmul.f32 1.442695, %v620_v45 }
 0x31f   : > { %1025 = vpow2.f32 %v621_v46 }
 0x329   : > { %v1026_v47 = vpop.eup %1025 }
 0x32a   : > { %919 = vmatmul.mubr.msk.f32.vlgmr.msra.gmra.mrb[4].mxu0 %vm512_vm5, %v1026_v47  ;;  %v623_v48 = vsel %vm512_vm5, %v1026_v47, 0.0 }
 0x32b   : > { %624 = vadd.xlane.f32.xlu1 %v623_v48 }
 0x366   : > { %v521_v49 = vpop.xlane.xlu0 %520 }
 0x367   : > { %1027 = vrcp.f32 %v521_v49 }
 0x371   : > { %v1028_v50 = vpop.eup %1027 }
 0x3ab   : > { %v591_v51 = vpop.f32.mrb[2].mxu0 }
 0x3ac   : > { %v596_v52 = vmul.f32 %v1028_v50, %v591_v51  ;;  %v915_v53 = vpop.f32.mrb[3].mxu0 }
 0x3ae   : > { %v598_v54 = vmul.f32 1.442695, %v596_v52  ;;  %vm597_vm6 = vcmp.gt.f32.partialorder %v596_v52, 0.0 }
 0x3b0   : > { %1029 = vpow2.f32 %v598_v54 }
 0x3b8   : > { %v625_v58 = vpop.xlane.xlu1 %624 }
 0x3b9   : > { %1031 = vrcp.f32 %v625_v58 }
 0x3ba   : > { %v1030_v55 = vpop.eup %1029 }
 0x3bb   : > { %v871_v56 = vadd.f32 -1.0, %v1030_v55 }
 0x3bd   : > { %v601_v57 = vsel %vm597_vm6, %v596_v52, %v871_v56 }
 0x3be   : > { %602 = vst [vmem:[%s321_s15] sm:$0xff] %v601_v57 }
 0x3c3   : > { %v1032_v59 = vpop.eup %1031 }
 0x3fd   : > { %v695_v60 = vpop.f32.mrb[4].mxu0 }
 0x3fe   : > { %v700_v61 = vmul.f32 %v1032_v59, %v695_v60  ;;  %v920_v62 = vpop.f32.mrb[5].mxu0 }
 0x400   : > { %v702_v63 = vmul.f32 1.442695, %v700_v61  ;;  %vm701_vm7 = vcmp.gt.f32.partialorder %v700_v61, 0.0 }
 0x402   : > { %1033 = vpow2.f32 %v702_v63 }
 0x40c   : > { %v1034_v0 = vpop.eup %1033 }
 0x40d   : > { %v873_v1 = vadd.f32 -1.0, %v1034_v0 }
 0x40f   : > { %v705_v2 = vsel %vm701_vm7, %v700_v61, %v873_v1 }
 0x410   : > { %706 = vst [vmem:[%s321_s15 + $0x8] sm:$0xff] %v705_v2 }
 0x411   : > { %1192 = shalt.err (!%p1189_p3)
}
 0x412   : > { %s1193_s12 = scalar_lea.hbm %s1601_s7, 256  ;;  %s1197_s2 = scalar_lea.hbm %s1650_s5, 512 }
 0x413   : > { %p1194_p9 = scmp.ne.s32.totalorder %s1601_s7, %s1193_s12  ;;  %p1198_p7 = scmp.lt.u32.totalorder %s1601_s7, %s1650_s5 }
 0x414   : > { %p1199_p12 = scmp.lt.u32.totalorder %s1197_s2, %s1193_s12  ;;  %p1201_p2 = scmp.lt.u32.totalorder %s1193_s12, %s1601_s7 }
 0x415   : > { %p1195_p13 = pnand %p1194_p9, %p1455_p5 }
 0x416   : > { %p1200_p1 = por %p1199_p12, %p1198_p7 }
 0x417   : > { %p1196_p11 = pneg %p1195_p13 }
 0x418   : > { %p1202_p4 = por %p1201_p2, %p1200_p1 }
 0x41a   : > { %p1203_p0 = pnand %p1202_p4, %p1196_p11 }
 0x41c   : > { %1206 = shalt.err (!%p1203_p0)
}
 0x41d   : > { %s1274_s8 = smov 128   ;;  %s1275_s24 = smov 8  }
 0x41e   : > { %945 = dma.vmem_to_hbm [thread:$0]  (%p1455_p5), %s1596_s11, 256, %s1601_s7, %s708_s29, %s1274_s8, %s1274_s8, %s1275_s24  }
 0x41f PF: > { %s736_s15 = sand.u32 1, %s1245_s18   ;;  %p1675_p8 = scmp.ne.s32.totalorder %s1658_s25, 0 }
 0x420   : > { %p1676_p6 = scmp.ge.s32.totalorder %s1257_s21, 2  ;;  %s737_s16 = scalar_lea.sflag [#allocation4], %s736_s15 }
 0x422   : > { %p965_p10 = pnand %p1676_p6, %p1675_p8 }
 0x424   : > { %1240 = dma.done.wait (!%p965_p10), %s737_s16, 256  }
 0x425   : > { %1242 = vsyncadd (!%p965_p10), %s737_s16, 4294967040  ;;  %p22_p3 = scmp.ge.s32.totalorder %s1441_s14, 4   ;;  %s1677_s18 = smov %s1249_s19 }
 0x426   : > { %s1678_s19 = smov %s1253_s20  ;;  %s1679_s20 = smov %s1451_s9 }
 0x427   : > { %s1680_s21 = smov %s1441_s14  ;;  %24 = sbr.rel (!%p22_p3) target bundleno = 12 (0xc), region = 110 }
 0x42e   :  { %742 = vsyncpa [#allocation3], 1 }
 0x42f   :  { %744 = vsyncpa [#allocation3 + $0x1], 1 }
 0x430   :  { %745 = vsyncpa [#allocation6], 1 }
 0x431   :  { %747 = vsyncpa [#allocation6 + $0x1], 1 }
 0x432   :  { %748 = vsyncpa [#allocation9], 1 }
 0x433   :  { %749 = vsyncpa [#allocation4], 1 }
 0x434   :  { %751 = vsyncpa [#allocation4 + $0x1], 1 }

</bundles_post_ra>
